<compile_context>
chip_gen: v7x
topology: tpu7x:2x2x1
jax: 0.10.0
libtpu: 0.0.40
codegen_flags: <defaults>
</compile_context>

<pallas_src>
import jax
import jax.numpy as jnp
from jax.experimental import pallas as pl
from jax.experimental.pallas import tpu as pltpu

LANES = 128

D_PROB = 0.5
assert 0.0 <= D_PROB < 1.0, "d_prob == 1.0 would divide by zero in the survivor scale"
DROPOUT_SCALE = 1.0 / (1.0 - D_PROB)
# keep an element iff its uint8 uniform >= round(p * 256)  =>  P(keep) = 1 - p exactly
KEEP_THRESHOLD = int(round(D_PROB * 256.0))


def dropout_linear_relu_kernel(x_ref, w_ref, rand_ref, o_ref):
    # --- Dropout mask: one integer compare per element (uint8 randoms widened on the VPU) ---
    keep = rand_ref[...].astype(jnp.int32) >= KEEP_THRESHOLD              # (BLOCK_B, N) bool

    # --- Linear(N -> 1, bias=False): masked product (weight row broadcast over batch), lane reduce ---
    prod = jnp.where(keep, x_ref[...].astype(jnp.float32) * w_ref[...], 0.0)
    s = jnp.sum(prod, axis=1, keepdims=True)                              # (BLOCK_B, 1)

    # --- Hoisted 1/(1-p) dropout scale + ReLU on the reduced per-sample scalars only ---
    o_ref[...] = jnp.maximum(s * DROPOUT_SCALE, 0.0)
    # TODO(synk): if batch grows to thousands, emit a lane-dense (num_blocks, BLOCK_B) output
    # (BLOCK_B a multiple of 128) instead of last-dim-1 to avoid masked vst.msk partial stores.


def net_forward(x, weight, rand_u8, *, block_b=None):
    """Dropout(p) -> Linear(N, 1, bias=False) -> ReLU.

    x:       (B, N) bfloat16/float32 activations
    weight:  (1, N) float32 linear weight row
    rand_u8: (B, N) uint8 uniforms in [0, 256) driving the dropout mask
    returns: (B, 1) float32
    """
    B, N = x.shape
    assert weight.shape == (1, N) and rand_u8.shape == (B, N)

    # Pad the feature dim to a lane multiple (e.g. lesson's 10000 -> 10240). Zero x / zero weight
    # pads contribute exactly 0 to the dot product regardless of the dropout mask.
    n_pad = ((N + LANES - 1) // LANES) * LANES
    if n_pad != N:
        x = jnp.pad(x, ((0, 0), (0, n_pad - N)))
        weight = jnp.pad(weight, ((0, 0), (0, n_pad - N)))
        rand_u8 = jnp.pad(rand_u8, ((0, 0), (0, n_pad - N)))

    if block_b is None:
        # Single step for small batches; 256-row tiles at scale (HBM-roofline sweet spot,
        # double-buffered bf16 x + uint8 rand stays under every generation's scoped VMEM).
        block_b = B if B <= 256 else 256
    assert B % block_b == 0, "batch must divide evenly into per-step blocks"
    num_blocks = B // block_b

    return pl.pallas_call(
        dropout_linear_relu_kernel,
        out_shape=jax.ShapeDtypeStruct((B, 1), jnp.float32),
        grid=(num_blocks,),
        in_specs=[
            pl.BlockSpec((block_b, n_pad), lambda b: (b, 0)),   # x          (per-batch block)
            pl.BlockSpec((1, n_pad), lambda b: (0, 0)),         # weight row (shared)
            pl.BlockSpec((block_b, n_pad), lambda b: (b, 0)),   # dropout randoms
        ],
        out_specs=pl.BlockSpec((block_b, 1), lambda b: (b, 0)),
        compiler_params=pltpu.CompilerParams(
            # Dual-TC split only pays off with >=2 meaningful grid steps (v7x); no-op on v5e/v6e.
            dimension_semantics=(("parallel",) if num_blocks > 1 else ("arbitrary",)),
            vmem_limit_bytes=32 * 1024 * 1024,
        ),
    )(x, weight, rand_u8)


if __name__ == "__main__":
    NEURAL_NUM = 512   # small lane-aligned stand-in for the lesson's 10000 (padding path covers 10000)
    BATCH = 16         # samples per call (amortizes launch overhead; lesson uses a single vector)

    key = jax.random.PRNGKey(0)
    k_w, k_mask = jax.random.split(key)

    # Lesson input is x = ones((neural_num,)); batched + bf16 to halve activation HBM traffic.
    x = jnp.ones((BATCH, NEURAL_NUM), dtype=jnp.bfloat16)

    # nn.Linear default init range: U(-1/sqrt(in_features), 1/sqrt(in_features))
    bound = 1.0 / float(NEURAL_NUM) ** 0.5
    weight = jax.random.uniform(k_w, (1, NEURAL_NUM), jnp.float32, minval=-bound, maxval=bound)

    # Host-fed uint8 uniforms for the dropout mask (1 byte per element).
    rand_u8 = jax.random.bits(k_mask, (BATCH, NEURAL_NUM), dtype=jnp.uint8)

    out = net_forward(x, weight, rand_u8)
    jax.block_until_ready(out)

    # Pure-JAX reference using the same precomputed mask.
    keep = rand_u8.astype(jnp.int32) >= KEEP_THRESHOLD
    x_drop = jnp.where(keep, x.astype(jnp.float32) * DROPOUT_SCALE, 0.0)
    ref = jnp.maximum(x_drop @ weight.T, 0.0)

    assert out.shape == (BATCH, 1)
    assert bool(jnp.isfinite(out).all())
    assert bool((out >= 0.0).all())
    assert bool(jnp.allclose(out, ref, rtol=1e-4, atol=1e-4))

    print("KERNEL_OK")
</pallas_src>

<mosaic_0001>
module attributes {stable_mosaic.version = 11 : i64} {
  func.func @dropout_linear_relu_kernel(%arg0: i32, %arg1: memref<16x512xbf16, #tpu.memory_space<vmem>>, %arg2: memref<1x512xf32, #tpu.memory_space<vmem>>, %arg3: memref<16x512xi8, #tpu.memory_space<vmem>>, %arg4: memref<16x1xf32, #tpu.memory_space<vmem>>) attributes {dimension_semantics = [#tpu.dimension_semantics<arbitrary>], iteration_bounds = array<i64: 1>, scalar_prefetch = 0 : i64, scratch_operands = 0 : i64, tpu.core_type = #tpu.core_type<tc>, window_params = [{transform_indices = @transform_0, window_bounds = array<i64: 16, 512>}, {pipeline_mode = #tpu.pipeline_mode<synchronous>, transform_indices = @transform_1, window_bounds = array<i64: 1, 512>}, {transform_indices = @transform_2, window_bounds = array<i64: 16, 512>}, {transform_indices = @transform_3, window_bounds = array<i64: 16, 1>}]} {
    %c0 = arith.constant 0 : index
    %c0_0 = arith.constant 0 : index
    %0 = vector.load %arg3[%c0, %c0_0] : memref<16x512xi8, #tpu.memory_space<vmem>>, vector<16x512xi8>
    %1 = arith.extui %0 : vector<16x512xi8> to vector<16x512xi32>
    %c128_i32 = arith.constant 128 : i32
    %2 = vector.broadcast %c128_i32 : i32 to vector<16x512xi32>
    %3 = arith.cmpi sge, %1, %2 : vector<16x512xi32>
    %c0_1 = arith.constant 0 : index
    %c0_2 = arith.constant 0 : index
    %4 = vector.load %arg1[%c0_1, %c0_2] : memref<16x512xbf16, #tpu.memory_space<vmem>>, vector<16x512xbf16>
    %5 = arith.extf %4 : vector<16x512xbf16> to vector<16x512xf32>
    %c0_3 = arith.constant 0 : index
    %c0_4 = arith.constant 0 : index
    %6 = vector.load %arg2[%c0_3, %c0_4] : memref<1x512xf32, #tpu.memory_space<vmem>>, vector<1x512xf32>
    %7 = vector.broadcast %6 : vector<1x512xf32> to vector<16x512xf32>
    %8 = arith.mulf %5, %7 : vector<16x512xf32>
    %cst = arith.constant 0.000000e+00 : f32
    %9 = vector.broadcast %cst : f32 to vector<16x512xf32>
    %10 = arith.select %3, %8, %9 : vector<16x512xi1>, vector<16x512xf32>
    %cst_5 = arith.constant dense<0.000000e+00> : vector<16xf32>
    %11 = vector.multi_reduction <add>, %10, %cst_5 [1] : vector<16x512xf32> to vector<16xf32>
    %12 = vector.shape_cast %11 : vector<16xf32> to vector<16x1xf32>
    %cst_6 = arith.constant 2.000000e+00 : f32
    %13 = vector.broadcast %cst_6 : f32 to vector<16x1xf32>
    %14 = arith.mulf %12, %13 : vector<16x1xf32>
    %cst_7 = arith.constant 0.000000e+00 : f32
    %15 = vector.broadcast %cst_7 : f32 to vector<16x1xf32>
    %16 = arith.maximumf %14, %15 : vector<16x1xf32>
    %c0_8 = arith.constant 0 : index
    %c0_9 = arith.constant 0 : index
    %17 = vector.load %arg4[%c0_8, %c0_9] : memref<16x1xf32, #tpu.memory_space<vmem>>, vector<16x1xf32>
    tpu.vector_store %arg4[%c0_8, %c0_9], %16 {strides = array<i32>} : memref<16x1xf32, #tpu.memory_space<vmem>>, vector<16x1xf32>,
    return
  }
  func.func @transform_0(%arg0: i32) -> (i32, i32) {
    %c0_i32 = arith.constant 0 : i32
    %c0_i32_0 = arith.constant 0 : i32
    return %arg0, %c0_i32 : i32, i32
  }
  func.func @transform_1(%arg0: i32) -> (i32, i32) {
    %c0_i32 = arith.constant 0 : i32
    %c0_i32_0 = arith.constant 0 : i32
    %c0_i32_1 = arith.constant 0 : i32
    return %c0_i32, %c0_i32_0 : i32, i32
  }
  func.func @transform_2(%arg0: i32) -> (i32, i32) {
    %c0_i32 = arith.constant 0 : i32
    %c0_i32_0 = arith.constant 0 : i32
    return %arg0, %c0_i32 : i32, i32
  }
  func.func @transform_3(%arg0: i32) -> (i32, i32) {
    %c0_i32 = arith.constant 0 : i32
    %c0_i32_0 = arith.constant 0 : i32
    return %arg0, %c0_i32 : i32, i32
  }
}

</mosaic_0001>

<bundles_post_ra>
// kernel: tpu_custom_call.1
= control target key start
LH: loop header
LB: loop body
LE: loop exit
PB: predicated region body
PF: predicated region fallthrough
CT: control target
= control target key end

     0   :  { %8 = vsyncpa [#allocation3], 0  ;;  %s305_s0 = inlined_call_operand.hbm [shape: bf16[16,512], index: 0, kind: input, shape index: {}]   ;;  %s306_s1 = inlined_call_operand.hbm [shape: f32[1,512], index: 1, kind: input, shape index: {}]   ;;  %s307_s2 = inlined_call_operand.hbm [shape: u8[16,512], index: 2, kind: input, shape index: {}]   ;;  %s308_s3 = inlined_call_operand.vmem [shape: f32[16,1], index: 3, kind: output, shape index: {}]  }
   0x1   :  { %9 = vsyncpa [#allocation5], 0  ;;  %s229_s12 = smov [#allocation4]   ;;  %s230_s14 = smov [#allocation2]  }
   0x2   :  { %s28_s13 = sshll.u32 %s229_s12, 4  ;;  %s15_s15 = sshll.u32 %s230_s14, 4  ;;  %s29_s13 = int_to_ptr.vmem [resolvable:$true] %s28_s13  ;;  %s256_s15 = int_to_ptr.vmem [resolvable:$true] %s15_s15 }
   0x3   :  { %s159_s18 = scalar_lea.hbm %s306_s1, 64 }
   0x4   :  { %p160_p0 = scmp.ne.s32.totalorder %s306_s1, %s159_s18  ;;  %p163_p1 = scmp.lt.u32.totalorder %s159_s18, %s306_s1 }
   0x6   :  { %p165_p2 = pnand %p163_p1, %p160_p0 }
   0x8   :  { %168 = shalt.err (!%p165_p2)
}
   0x9   :  { %s169_s23 = scalar_lea.vmem %s29_s13, 64  ;;  %p174_p4 = scmp.lt.s32.totalorder %s29_s13, %s29_s13 }
   0xa   :  { %p170_p3 = scmp.ne.s32.totalorder %s29_s13, %s169_s23  ;;  %p175_p5 = scmp.lt.s32.totalorder %s169_s23, %s169_s23 }
   0xc   :  { %p176_p6 = por %p175_p5, %p174_p4 }
   0xe   :  { %p177_p7 = pnand %p176_p6, %p170_p3 }
  0x10   :  { %180 = shalt.err (!%p177_p7)
}
  0x11   :  { %31 = dma.hbm_to_vmem [thread:$0]  %s306_s1, 64, %s29_s13, [#allocation5]  }
  0x12   :  { %s181_s28 = scalar_lea.hbm %s305_s0, 512 }
  0x13   :  { %p182_p8 = scmp.ne.s32.totalorder %s305_s0, %s181_s28  ;;  %p185_p9 = scmp.lt.u32.totalorder %s181_s28, %s305_s0 }
  0x15   :  { %p187_p10 = pnand %p185_p9, %p182_p8 }
  0x17   :  { %190 = shalt.err (!%p187_p10)
}
  0x18   :  { %s191_s6 = scalar_lea.vmem %s256_s15, 512  ;;  %p196_p12 = scmp.lt.s32.totalorder %s256_s15, %s256_s15 }
  0x19   :  { %p192_p11 = scmp.ne.s32.totalorder %s256_s15, %s191_s6  ;;  %p197_p13 = scmp.lt.s32.totalorder %s191_s6, %s191_s6 }
  0x1b   :  { %p198_p0 = por %p197_p13, %p196_p12 }
  0x1d   :  { %p199_p1 = pnand %p198_p0, %p192_p11 }
  0x1f   :  { %202 = shalt.err (!%p199_p1)
}
  0x20   :  { %s231_s1 = smov 256   ;;  %s232_s7 = smov 16  }
  0x21   :  { %21 = dma.hbm_to_vmem [thread:$0]  %s305_s0, 512, %s256_s15, [#allocation3], %s231_s1, %s231_s1, %s232_s7  }
  0x22   :  { %s233_s10 = smov [#allocation6]   ;;  %s203_s14 = scalar_lea.hbm %s307_s2, 256 }
  0x23   :  { %s37_s11 = sshll.u32 %s233_s10, 4  ;;  %p204_p2 = scmp.ne.s32.totalorder %s307_s2, %s203_s14  ;;  %s38_s11 = int_to_ptr.vmem [resolvable:$true] %s37_s11 }
  0x24   :  { %p207_p3 = scmp.lt.u32.totalorder %s203_s14, %s307_s2 }
  0x26   :  { %p209_p4 = pnand %p207_p3, %p204_p2 }
  0x28   :  { %212 = shalt.err (!%p209_p4)
}
  0x29   :  { %s213_s20 = scalar_lea.vmem %s38_s11, 256  ;;  %p218_p6 = scmp.lt.s32.totalorder %s38_s11, %s38_s11 }
  0x2a   :  { %p214_p5 = scmp.ne.s32.totalorder %s38_s11, %s213_s20  ;;  %p219_p7 = scmp.lt.s32.totalorder %s213_s20, %s213_s20 }
  0x2c   :  { %p220_p8 = por %p219_p7, %p218_p6 }
  0x2e   :  { %p221_p9 = pnand %p220_p8, %p214_p5 }
  0x30   :  { %224 = shalt.err (!%p221_p9)
}
  0x31   :  { %s234_s0 = smov 128   ;;  %s235_s15 = smov 8  }
  0x32   :  { %43 = dma.hbm_to_vmem [thread:$0]  %s307_s2, 256, %s38_s11, [#allocation5], %s234_s0, %s234_s0, %s235_s15  }
  0x33   :  { %225 = dma.done.wait [#allocation3], 512  }
  0x34   :  { %226 = vsyncadd [#allocation3], 4294966784 }
  0x35   :  { %227 = dma.done.wait [#allocation5], 320  }
  0x36   :  { %228 = vsyncadd [#allocation5], 4294966976  ;;  %v93_v0 = vlaneseq  ;;  %v53_v3 = vld [vmem:[#allocation6] sm:$0xff]  ;;  %v91_v13 = vld [vmem:[#allocation4] sm:$0xf]  ;;  %vm143_vm8 = vcmask 7168  }
  0x37   :  { %v79_v4 = vld [vmem:[#allocation2] sm:$0xff]  ;;  %v80_v5 = vld [vmem:[#allocation2 + $0x8] sm:$0xff]  ;;  %v55_v9 = vunpack.c.0.s8 %v53_v3  ;;  %v56_v10 = vunpack.c.1.s8 %v53_v3  ;;  %v57_v11 = vunpack.c.2.s8 %v53_v3  ;;  %v58_v12 = vunpack.c.3.s8 %v53_v3  ;;  %v81_v35 = vld [vmem:[#allocation2 + $0x10] sm:$0xff] }
  0x38   :  { %v94_v1 = vshrl.u32 %v93_v0, 7  ;;  %v83_v14 = vunpack.c.l.bf16 %v79_v4  ;;  %v84_v15 = vunpack.c.h.bf16 %v79_v4  ;;  %v85_v16 = vunpack.c.l.bf16 %v80_v5  ;;  %v54_v26 = vld [vmem:[#allocation6 + $0x8] sm:$0xff]  ;;  %v82_v36 = vld [vmem:[#allocation2 + $0x18] sm:$0xff] }
  0x39   :  { %v86_v17 = vunpack.c.h.bf16 %v80_v5  ;;  %v63_v18 = vand.u32 255, %v55_v9  ;;  %v64_v19 = vand.u32 255, %v56_v10  ;;  %v65_v20 = vand.u32 255, %v57_v11 }
  0x3a   :  { %v95_v2 = vsub.s32 0, %v94_v1  ;;  %v99_v6 = vsub.s32 1, %v94_v1  ;;  %v103_v7 = vsub.s32 2, %v94_v1  ;;  %v107_v8 = vsub.s32 3, %v94_v1 }
  0x3b   :  { %v66_v21 = vand.u32 255, %v58_v12  ;;  %vm71_vm0 = vcmp.ge.s32.totalorder %v63_v18, 128  ;;  %vm72_vm1 = vcmp.ge.s32.totalorder %v64_v19, 128  ;;  %vm73_vm2 = vcmp.ge.s32.totalorder %v65_v20, 128 }
  0x3c   :  { %v96_v22 = vrot.slane %v91_v13, %v95_v2  ;;  %v100_v23 = vrot.slane %v91_v13, %v99_v6  ;;  %v104_v24 = vrot.slane %v91_v13, %v103_v7  ;;  %v108_v25 = vrot.slane %v91_v13, %v107_v8 }
  0x3d   :  { %vm74_vm3 = vcmp.ge.s32.totalorder %v66_v21, 128  ;;  %v59_v31 = vunpack.c.0.s8 %v54_v26  ;;  %v60_v32 = vunpack.c.1.s8 %v54_v26  ;;  %v61_v33 = vunpack.c.2.s8 %v54_v26 }
  0x3e   :  { %v113_v27 = vmul.f32 %v96_v22, %v83_v14  ;;  %v114_v28 = vmul.f32 %v100_v23, %v84_v15  ;;  %v115_v29 = vmul.f32 %v104_v24, %v85_v16  ;;  %v116_v30 = vmul.f32 %v108_v25, %v86_v17 }
  0x3f   :  { %v62_v34 = vunpack.c.3.s8 %v54_v26  ;;  %v67_v42 = vand.u32 255, %v59_v31  ;;  %v68_v43 = vand.u32 255, %v60_v32  ;;  %v69_v44 = vand.u32 255, %v61_v33 }
  0x40   :  { %v121_v37 = vsel %vm71_vm0, %v113_v27, 0.0  ;;  %v122_v38 = vsel %vm72_vm1, %v114_v28, 0.0  ;;  %v123_v39 = vsel %vm73_vm2, %v115_v29, 0.0  ;;  %v124_v40 = vsel %vm74_vm3, %v116_v30, 0.0 }
  0x41   :  { %v129_v41 = vadd.f32 %v122_v38, %v121_v37  ;;  %v70_v45 = vand.u32 255, %v62_v34  ;;  %v87_v46 = vunpack.c.l.bf16 %v81_v35  ;;  %v88_v47 = vunpack.c.h.bf16 %v81_v35 }
  0x42   :  { %v89_v48 = vunpack.c.l.bf16 %v82_v36  ;;  %vm75_vm4 = vcmp.ge.s32.totalorder %v67_v42, 128  ;;  %vm76_vm5 = vcmp.ge.s32.totalorder %v68_v43, 128  ;;  %vm77_vm6 = vcmp.ge.s32.totalorder %v69_v44, 128 }
  0x43   :  { %v130_v49 = vadd.f32 %v129_v41, %v123_v39  ;;  %v90_v50 = vunpack.c.h.bf16 %v82_v36  ;;  %v117_v51 = vmul.f32 %v96_v22, %v87_v46  ;;  %v118_v52 = vmul.f32 %v100_v23, %v88_v47 }
  0x44   :  { %vm78_vm7 = vcmp.ge.s32.totalorder %v70_v45, 128  ;;  %v119_v54 = vmul.f32 %v104_v24, %v89_v48 }
  0x45   :  { %v131_v53 = vadd.f32 %v130_v49, %v124_v40  ;;  %v120_v55 = vmul.f32 %v108_v25, %v90_v50  ;;  %v125_v56 = vsel %vm75_vm4, %v117_v51, 0.0  ;;  %v126_v57 = vsel %vm76_vm5, %v118_v52, 0.0 }
  0x46   :  { %v127_v58 = vsel %vm77_vm6, %v119_v54, 0.0  ;;  %v134_v59 = vadd.f32 %v126_v57, %v125_v56 }
  0x47   :  { %132 = vadd.xlane.f32.xlu0 %v131_v53  ;;  %v128_v60 = vsel %vm78_vm7, %v120_v55, 0.0 }
  0x48   :  { %v135_v61 = vadd.f32 %v134_v59, %v127_v58 }
  0x4a   :  { %v136_v62 = vadd.f32 %v135_v61, %v128_v60 }
  0x4c   :  { %137 = vadd.xlane.f32.xlu0 %v136_v62 }
  0xd4   :  { %v133_v63 = vpop.xlane.xlu0 %132 }
  0xd5   :  { %v139_v0 = vmul.f32 2.0, %v133_v63 }
  0xd7   :  { %v141_v1 = vmax.f32 %v139_v0, 0.0 }
  0xd9   :  { %144 = vst.msk [vmem:[%s308_s3] sm:$0xff] %vm143_vm8, %v141_v1  ;;  %v138_v2 = vpop.xlane.xlu0 %137 }
  0xda   :  { %v140_v3 = vmul.f32 2.0, %v138_v2 }
  0xdc   :  { %v142_v4 = vmax.f32 %v140_v3, 0.0 }
  0xde   :  { %145 = vst.msk [vmem:[%s308_s3 + $0x8] sm:$0xff] %vm143_vm8, %v142_v4 }
  0xdf   :  { %150 = vsyncpa [#allocation3], 1 }
  0xe0   :  { %151 = vsyncpa [#allocation5], 1 }

</bundles_post_ra>
